<compile_context>
chip_gen: v7x
topology: tpu7x:2x2x1
jax: 0.10.0
libtpu: 0.0.40
codegen_flags: <defaults>
</compile_context>

<pallas_src>
import jax
import jax.numpy as jnp
import numpy as np
from jax import lax
from jax.experimental import pallas as pl
from jax.experimental.pallas import tpu as pltpu


# ---------------------------------------------------------------------------
# Fused kernel: patch embed (+bias +pos) -> cross-attention scores -> softmax
# ---------------------------------------------------------------------------
def _fused_token_attn_kernel(patches_ref, w_ref, b_ref, pos_ref, qt_ref, qb_ref,
                             out_ref):
    # patches_ref: (1, N, K) bf16  unfolded image patches (K = C*p*p)
    # w_ref:       (K, D)    bf16  conv weight as a matmul
    # b_ref:       (1, D)    f32   conv bias
    # pos_ref:     (N, D)    bf16  positional embedding
    # qt_ref:      (T, D)    bf16  q_tilde = scale * (tokens @ q_w.T + q_b) @ k_w
    # qb_ref:      (T, 1)    f32   scale * (q @ k_b)
    # out_ref:     (1, T, N) f32   attention map

    # Patch embed + pos: stays in VMEM / vregs, never hits HBM.
    x = jnp.dot(patches_ref[0], w_ref[...],
                preferred_element_type=jnp.float32)          # (N, D) f32 (MXU)
    x = x + b_ref[...] + pos_ref[...]                        # (N, D) f32

    # Scores: both operands contract on their last (lane) axis -> no XLU transpose,
    # no (N, D) -> (N, D) K-projection (folded onto the tiny token side already).
    s = lax.dot_general(
        qt_ref[...], x.astype(jnp.bfloat16),
        dimension_numbers=(((1,), (1,)), ((), ())),
        preferred_element_type=jnp.float32,
    ) + qb_ref[...]                                          # (T, N) f32

    # Row softmax in f32.
    m = jnp.max(s, axis=-1, keepdims=True)
    e = jnp.exp(s - m)
    denom = jnp.sum(e, axis=-1, keepdims=True)
    out_ref[0] = e * pl.reciprocal(denom, approx=True)


def fused_token_attn_pallas(patches, w_t, bias, pos, q_tilde, qb):
    B, N, K = patches.shape
    D = w_t.shape[1]
    T = q_tilde.shape[0]
    return pl.pallas_call(
        _fused_token_attn_kernel,
        out_shape=jax.ShapeDtypeStruct((B, T, N), jnp.float32),
        grid=(B,),
        in_specs=[
            pl.BlockSpec((1, N, K), lambda b: (b, 0, 0)),   # per-batch patches
            pl.BlockSpec((K, D), lambda b: (0, 0)),         # constant -> DMA'd once
            pl.BlockSpec((1, D), lambda b: (0, 0)),
            pl.BlockSpec((N, D), lambda b: (0, 0)),
            pl.BlockSpec((T, D), lambda b: (0, 0)),
            pl.BlockSpec((T, 1), lambda b: (0, 0)),
        ],
        out_specs=pl.BlockSpec((1, T, N), lambda b: (b, 0, 0)),
        compiler_params=pltpu.CompilerParams(
            dimension_semantics=("parallel",),
            vmem_limit_bytes=48 * 1024 * 1024,
        ),
    )(patches, w_t, bias, pos, q_tilde, qb)


# ---------------------------------------------------------------------------
# Parameter folding (done ONCE, not per forward call)
# ---------------------------------------------------------------------------
def fold_params(params, patch_size):
    conv_w = params["conv_w"]                                  # (D, C, p, p)
    D = conv_w.shape[0]
    K = conv_w.shape[1] * patch_size * patch_size

    w_t = conv_w.reshape(D, K).T.astype(jnp.bfloat16)          # (K, D)
    bias = params["conv_b"].reshape(1, D).astype(jnp.float32)  # (1, D)
    pos = params["pos_embed"].reshape(-1, D).astype(jnp.bfloat16)  # (N, D)

    # TokenCreation query path + K projection folded onto the (tiny) token side,
    # with the 1/sqrt(D) scale folded in.
    q = params["tokens"] @ params["q_w"].T + params["q_b"]     # (T, D) f32
    scale = float(D) ** -0.5
    q_tilde = (scale * (q @ params["k_w"])).astype(jnp.bfloat16)            # (T, D)
    qb = (scale * (q @ params["k_b"])).reshape(-1, 1).astype(jnp.float32)   # (T, 1)

    return {"w_t": w_t, "bias": bias, "pos": pos, "q_tilde": q_tilde, "qb": qb}


# ---------------------------------------------------------------------------
# TokenPreprocess forward (glue in plain JAX, hot path is the fused kernel)
# ---------------------------------------------------------------------------
def token_preprocess_forward(x_nchw, folded, patch_size):
    B, C, H, W = x_nchw.shape
    p = patch_size
    Hp, Wp = H // p, W // p
    N = Hp * Wp

    # Unfold the strided conv into patches: (B, N, C*p*p) with (c, kh, kw) order
    # (identical to the Conv2d weight layout), so the conv is a plain matmul.
    patches = (
        x_nchw.reshape(B, C, Hp, p, Wp, p)
        .transpose(0, 2, 4, 1, 3, 5)
        .reshape(B, N, C * p * p)
        .astype(jnp.bfloat16)
    )

    return fused_token_attn_pallas(
        patches, folded["w_t"], folded["bias"], folded["pos"],
        folded["q_tilde"], folded["qb"],
    )                                                          # (B, T, N)


def reference_forward(x_nchw, params, patch_size):
    """Pure-JAX f32 reference mirroring the PyTorch semantics."""
    B = x_nchw.shape[0]
    D = params["conv_w"].shape[0]
    y = lax.conv_general_dilated(
        x_nchw, params["conv_w"],
        window_strides=(patch_size, patch_size), padding="VALID",
        dimension_numbers=("NCHW", "OIHW", "NCHW"),
    ) + params["conv_b"].reshape(1, D, 1, 1)
    x_emb = y.reshape(B, D, -1).transpose(0, 2, 1) + params["pos_embed"]
    q = params["tokens"] @ params["q_w"].T + params["q_b"]
    k = x_emb @ params["k_w"].T + params["k_b"]
    s = jnp.einsum("td,bnd->btn", q, k) * (float(D) ** -0.5)
    return jax.nn.softmax(s, axis=-1)


if __name__ == "__main__":
    # Small shapes consistent with the module (img 224->16, patch 4, chans 3,
    # embed 384->32, num_tokens 196->8).
    B, C, IMG, P, D, T = 2, 3, 16, 4, 32, 8
    N = (IMG // P) ** 2

    key = jax.random.PRNGKey(0)
    k_x, k_cw, k_cb, k_pos, k_tok, k_qw, k_qb, k_kw, k_kb = jax.random.split(key, 9)

    x = jax.random.normal(k_x, (B, C, IMG, IMG), dtype=jnp.float32)

    params = {
        "conv_w": 0.02 * jax.random.normal(k_cw, (D, C, P, P), dtype=jnp.float32),
        "conv_b": 0.02 * jax.random.normal(k_cb, (D,), dtype=jnp.float32),
        # module inits pos_embed to zeros; small deterministic noise to exercise the add
        "pos_embed": 0.02 * jax.random.normal(k_pos, (1, N, D), dtype=jnp.float32),
        "tokens": 0.02 * jax.random.normal(k_tok, (T, D), dtype=jnp.float32),
        "q_w": 0.02 * jax.random.normal(k_qw, (D, D), dtype=jnp.float32),
        "q_b": 0.02 * jax.random.normal(k_qb, (D,), dtype=jnp.float32),
        "k_w": 0.02 * jax.random.normal(k_kw, (D, D), dtype=jnp.float32),
        "k_b": 0.02 * jax.random.normal(k_kb, (D,), dtype=jnp.float32),
    }

    folded = jax.tree_util.tree_map(jax.block_until_ready, fold_params(params, P))

    attn = jax.block_until_ready(token_preprocess_forward(x, folded, P))
    ref = jax.block_until_ready(reference_forward(x, params, P))

    assert attn.shape == (B, T, N), attn.shape
    # bf16 matmul operands + approx reciprocal => compare against f32 ref with
    # loosened tolerance (per perf-review correctness note).
    np.testing.assert_allclose(np.asarray(attn), np.asarray(ref), rtol=2e-2, atol=2e-3)
    # attention rows sum to ~1 (approx reciprocal -> small tolerance)
    np.testing.assert_allclose(np.asarray(attn.sum(-1)), np.ones((B, T)),
                               rtol=2e-3, atol=2e-3)

    print("KERNEL_OK")
</pallas_src>

<mosaic_0001>
module attributes {stable_mosaic.version = 11 : i64} {
  func.func @_fused_token_attn_kernel(%arg0: i32, %arg1: memref<1x16x48xbf16, #tpu.memory_space<vmem>>, %arg2: memref<48x32xbf16, #tpu.memory_space<vmem>>, %arg3: memref<1x32xf32, #tpu.memory_space<vmem>>, %arg4: memref<16x32xbf16, #tpu.memory_space<vmem>>, %arg5: memref<8x32xbf16, #tpu.memory_space<vmem>>, %arg6: memref<8x1xf32, #tpu.memory_space<vmem>>, %arg7: memref<1x8x16xf32, #tpu.memory_space<vmem>>) attributes {dimension_semantics = [#tpu.dimension_semantics<parallel>], iteration_bounds = array<i64: 2>, scalar_prefetch = 0 : i64, scratch_operands = 0 : i64, tpu.core_type = #tpu.core_type<tc>, window_params = [{transform_indices = @transform_0, window_bounds = array<i64: 1, 16, 48>}, {pipeline_mode = #tpu.pipeline_mode<synchronous>, transform_indices = @transform_1, window_bounds = array<i64: 48, 32>}, {pipeline_mode = #tpu.pipeline_mode<synchronous>, transform_indices = @transform_2, window_bounds = array<i64: 1, 32>}, {pipeline_mode = #tpu.pipeline_mode<synchronous>, transform_indices = @transform_3, window_bounds = array<i64: 16, 32>}, {pipeline_mode = #tpu.pipeline_mode<synchronous>, transform_indices = @transform_4, window_bounds = array<i64: 8, 32>}, {pipeline_mode = #tpu.pipeline_mode<synchronous>, transform_indices = @transform_5, window_bounds = array<i64: 8, 1>}, {transform_indices = @transform_6, window_bounds = array<i64: 1, 8, 16>}]} {
    %c0 = arith.constant 0 : index
    %c0_0 = arith.constant 0 : index
    %c0_1 = arith.constant 0 : index
    %0 = vector.load %arg1[%c0, %c0_0, %c0_1] : memref<1x16x48xbf16, #tpu.memory_space<vmem>>, vector<1x16x48xbf16>
    %1 = vector.shape_cast %0 : vector<1x16x48xbf16> to vector<16x48xbf16>
    %c0_2 = arith.constant 0 : index
    %c0_3 = arith.constant 0 : index
    %2 = vector.load %arg2[%c0_2, %c0_3] : memref<48x32xbf16, #tpu.memory_space<vmem>>, vector<48x32xbf16>
    %cst = arith.constant dense<0.000000e+00> : vector<16x32xf32>
    %3 = tpu.matmul %1, %2, %cst {dimension_numbers = #tpu.dot_dimension_numbers<[1], [0], [0], [1], [0, 0, 1, 1], [], []>} : vector<16x48xbf16>, vector<48x32xbf16>, vector<16x32xf32> -> vector<16x32xf32>
    %c0_4 = arith.constant 0 : index
    %c0_5 = arith.constant 0 : index
    %4 = vector.load %arg3[%c0_4, %c0_5] : memref<1x32xf32, #tpu.memory_space<vmem>>, vector<1x32xf32>
    %5 = vector.broadcast %4 : vector<1x32xf32> to vector<16x32xf32>
    %6 = arith.addf %3, %5 : vector<16x32xf32>
    %c0_6 = arith.constant 0 : index
    %c0_7 = arith.constant 0 : index
    %7 = vector.load %arg4[%c0_6, %c0_7] : memref<16x32xbf16, #tpu.memory_space<vmem>>, vector<16x32xbf16>
    %8 = arith.extf %7 : vector<16x32xbf16> to vector<16x32xf32>
    %9 = arith.addf %6, %8 : vector<16x32xf32>
    %c0_8 = arith.constant 0 : index
    %c0_9 = arith.constant 0 : index
    %10 = vector.load %arg5[%c0_8, %c0_9] : memref<8x32xbf16, #tpu.memory_space<vmem>>, vector<8x32xbf16>
    %11 = arith.truncf %9 : vector<16x32xf32> to vector<16x32xbf16>
    %cst_10 = arith.constant dense<0.000000e+00> : vector<8x16xf32>
    %12 = tpu.matmul %10, %11, %cst_10 {dimension_numbers = #tpu.dot_dimension_numbers<[1], [1], [0], [0], [0, 0, 1, 0], [], []>} : vector<8x32xbf16>, vector<16x32xbf16>, vector<8x16xf32> -> vector<8x16xf32>
    %c0_11 = arith.constant 0 : index
    %c0_12 = arith.constant 0 : index
    %13 = vector.load %arg6[%c0_11, %c0_12] : memref<8x1xf32, #tpu.memory_space<vmem>>, vector<8x1xf32>
    %14 = vector.broadcast %13 : vector<8x1xf32> to vector<8x16xf32>
    %15 = arith.addf %12, %14 : vector<8x16xf32>
    %cst_13 = arith.constant dense<0xFF800000> : vector<8xf32>
    %16 = vector.multi_reduction <maximumf>, %15, %cst_13 [1] : vector<8x16xf32> to vector<8xf32>
    %17 = vector.shape_cast %16 : vector<8xf32> to vector<8x1xf32>
    %18 = vector.broadcast %17 : vector<8x1xf32> to vector<8x16xf32>
    %19 = arith.subf %15, %18 : vector<8x16xf32>
    %20 = math.exp %19 : vector<8x16xf32>
    %cst_14 = arith.constant dense<0.000000e+00> : vector<8xf32>
    %21 = vector.multi_reduction <add>, %20, %cst_14 [1] : vector<8x16xf32> to vector<8xf32>
    %22 = vector.shape_cast %21 : vector<8xf32> to vector<8x1xf32>
    %23 = tpu.reciprocal %22 {approx = true} : vector<8x1xf32> -> vector<8x1xf32>
    %24 = vector.broadcast %23 : vector<8x1xf32> to vector<8x16xf32>
    %25 = arith.mulf %20, %24 : vector<8x16xf32>
    %c0_15 = arith.constant 0 : index
    %c0_16 = arith.constant 0 : index
    %c0_17 = arith.constant 0 : index
    %26 = vector.load %arg7[%c0_15, %c0_16, %c0_17] : memref<1x8x16xf32, #tpu.memory_space<vmem>>, vector<1x8x16xf32>
    %27 = vector.shape_cast %26 : vector<1x8x16xf32> to vector<8x16xf32>
    %28 = vector.shape_cast %25 : vector<8x16xf32> to vector<1x8x16xf32>
    tpu.vector_store %arg7[%c0_15, %c0_16, %c0_17], %28 {strides = array<i32>} : memref<1x8x16xf32, #tpu.memory_space<vmem>>, vector<1x8x16xf32>,
    return
  }
  func.func @transform_0(%arg0: i32) -> (i32, i32, i32) {
    %c0_i32 = arith.constant 0 : i32
    %c0_i32_0 = arith.constant 0 : i32
    %c0_i32_1 = arith.constant 0 : i32
    return %arg0, %c0_i32, %c0_i32_0 : i32, i32, i32
  }
  func.func @transform_1(%arg0: i32) -> (i32, i32) {
    %c0_i32 = arith.constant 0 : i32
    %c0_i32_0 = arith.constant 0 : i32
    %c0_i32_1 = arith.constant 0 : i32
    return %c0_i32, %c0_i32_0 : i32, i32
  }
  func.func @transform_2(%arg0: i32) -> (i32, i32) {
    %c0_i32 = arith.constant 0 : i32
    %c0_i32_0 = arith.constant 0 : i32
    %c0_i32_1 = arith.constant 0 : i32
    return %c0_i32, %c0_i32_0 : i32, i32
  }
  func.func @transform_3(%arg0: i32) -> (i32, i32) {
    %c0_i32 = arith.constant 0 : i32
    %c0_i32_0 = arith.constant 0 : i32
    %c0_i32_1 = arith.constant 0 : i32
    return %c0_i32, %c0_i32_0 : i32, i32
  }
  func.func @transform_4(%arg0: i32) -> (i32, i32) {
    %c0_i32 = arith.constant 0 : i32
    %c0_i32_0 = arith.constant 0 : i32
    %c0_i32_1 = arith.constant 0 : i32
    return %c0_i32, %c0_i32_0 : i32, i32
  }
  func.func @transform_5(%arg0: i32) -> (i32, i32) {
    %c0_i32 = arith.constant 0 : i32
    %c0_i32_0 = arith.constant 0 : i32
    %c0_i32_1 = arith.constant 0 : i32
    return %c0_i32, %c0_i32_0 : i32, i32
  }
  func.func @transform_6(%arg0: i32) -> (i32, i32, i32) {
    %c0_i32 = arith.constant 0 : i32
    %c0_i32_0 = arith.constant 0 : i32
    %c0_i32_1 = arith.constant 0 : i32
    return %arg0, %c0_i32, %c0_i32_0 : i32, i32, i32
  }
}

</mosaic_0001>

<bundles_post_ra>
// kernel: tpu_custom_call.1
= control target key start
LH: loop header
LB: loop body
LE: loop exit
PB: predicated region body
PF: predicated region fallthrough
CT: control target
= control target key end

     0   :  { %11 = vsyncpa [#allocation3], 0  ;;  %s804_s0 = inlined_call_operand.vmem [shape: bf16[2,16,48], index: 0, kind: input, shape index: {}]   ;;  %s805_s1 = inlined_call_operand.vmem [shape: bf16[48,32], index: 1, kind: input, shape index: {}]   ;;  %s806_s2 = inlined_call_operand.vmem [shape: f32[1,32], index: 2, kind: input, shape index: {}]   ;;  %s807_s3 = inlined_call_operand.vmem [shape: bf16[16,32], index: 3, kind: input, shape index: {}]   ;;  %s808_s4 = inlined_call_operand.vmem [shape: bf16[8,32], index: 4, kind: input, shape index: {}]   ;;  %s809_s5 = inlined_call_operand.vmem [shape: f32[8,1], index: 5, kind: input, shape index: {}]   ;;  %s810_s6 = inlined_call_operand.hbm [shape: f32[2,8,16], index: 6, kind: output, shape index: {}]  }
   0x1   :  { %13 = vsyncpa [#allocation3 + $0x1], 0  ;;  %s680_s21 = smov 0   ;;  %s682_s22 = smov 0  }
   0x2   :  { %s684_s23 = smov 0   ;;  %s686_s24 = smov 0  }
   0x3 LB: > { %s701_s25 = sadd.s32 4294967295, %s639_s24   ;;  %s481_s26 = sadd.s32 4294967294, %s639_s24   ;;  %s639_s24 = sphi %s686_s24, %s816_s24   ;;  %s635_s23 = sphi %s684_s23, %s815_s23   ;;  %s631_s22 = sphi %s682_s22, %s814_s22   ;;  %s627_s21 = sphi %s680_s21, %s813_s21  }
   0x4   : > { %s705_s27 = sadd.s32 1, %s639_s24   ;;  %s157_s28 = sadd.s32 1, %s635_s23 }
   0x5   : > { %s154_s29 = ssub.s32 %s639_s24, %s705_s27  ;;  %p167_p0 = scmp.ne.s32.totalorder %s635_s23, %s631_s22 }
   0x6   : > { %p155_p1 = scmp.eq.s32.totalorder %s154_s29, 0  ;;  %p168_p2 = scmp.eq.s32.totalorder %s701_s25, 1 }
   0x7   : > { %p173_p3 = scmp.ne.s32.totalorder %s631_s22, %s627_s21  ;;  %p174_p4 = scmp.eq.s32.totalorder %s481_s26, 1 }
   0x8   : > { %s716_s30 = scalar_select %p155_p1, %s635_s23, %s157_s28  }
   0x9   : > { %p718_p5 = por %p168_p2, %p167_p0  ;;  %p722_p6 = por %p174_p4, %p173_p3 }
   0xa   : > { %p484_p7 = scmp.ge.s32.totalorder %s639_s24, 1  ;;  %p215_p8 = scmp.lt.s32.totalorder %s639_s24, 3 }
   0xc   : > { %p216_p9 = pnand %p484_p7, %p215_p8 }
   0xd   : > { %v569_v0 = vld [vmem:[%s805_s1] sm:$0xff] (!%p216_p9)   ;;  %v641_v1 = vmov (!%p216_p9), 0.0   ;;  %v570_v2 = vld [vmem:[%s805_s1 + $0x8] sm:$0xff] (!%p216_p9)   ;;  %vm642_vm0 = vmmov (!%p216_p9), 0   ;;  %p245_p10 = scmp.lt.s32.totalorder (!%p216_p9), %s701_s25, 1  ;;  %v571_v3 = vld [vmem:[%s805_s1 + $0x10] sm:$0xff] (!%p216_p9)  }
   0xe   : > { %219 = sbr.rel (%p216_p9) target bundleno = 796 (0x31c), region = 44  ;;  %510 = vmatprep.subr.bf16.mxu0 (!%p216_p9), %v641_v1  ;;  %520 = vmatprep.subr.bf16.mxu1 (!%p216_p9), %v641_v1  ;;  %vm289_vm1 = vcmask (!%p216_p9), 392192   ;;  %v342_v5 = vld [vmem:[%s809_s5] sm:$0xff] (!%p216_p9)  ;;  %v643_v6 = vmov (!%p216_p9), 0   ;;  %vm348_vm2 = vcmask (!%p216_p9), 261120   ;;  %vm395_vm3 = vcmask (!%p216_p9), 130048  }
   0xf   : > { %511 = vmatpush3.bf16.msra.mxu0 (!%p216_p9), %v569_v0  ;;  %516 = vmatprep.mubr.msk.bf16.mxu0 (!%p216_p9), %vm642_vm0, %v641_v1  ;;  %v488_v7 = vld [vmem:[%s806_s2] ss:$0 sm:$0xff] (!%p216_p9)  ;;  %s496_s15 = sshll.u32 (!%p216_p9), %s701_s25, 7 }
  0x10   : > { %512 = vmatprep.subr.bf16.mxu0 (!%p216_p9), %v641_v1  ;;  %522 = vmatprep.mubr.msk.bf16.mxu1 (!%p216_p9), %vm642_vm0, %v641_v1  ;;  %v501_v8 = vld [vmem:[%s807_s3] sm:$0xff] (!%p216_p9)   ;;  %s761_s20 = scalar_lea.hbm (!%p216_p9), %s810_s6, %s496_s15 }
  0x11   : > { %568 = vset.pattern.permute.xlu0 (!%p216_p9), %v643_v6  ;;  %v502_v11 = vunpack.c.l.bf16 (!%p216_p9), %v501_v8  ;;  %v503_v13 = vunpack.c.h.bf16 (!%p216_p9), %v501_v8  ;;  %v340_v21 = vld [vmem:[%s808_s4] sm:$0xf] (!%p216_p9) }
  0x12   : > { %345 = vperm.xlu0 (!%p216_p9), %568, %v342_v5  }
  0x13   : > { %513 = vmatpush3.bf16.msra.mxu0 (!%p216_p9), %v570_v2 }
  0x14   : > { %514 = vmatprep.subr.bf16.mxu0 (!%p216_p9), %v641_v1 }
  0x15   : > { %s246_s13 = scalar_select %p245_p10, %s701_s25, 1 }
  0x16   : > { %s644_s25 = smov [#allocation2]  }
  0x17   : > { %s499_s16 = sshll.u32 %s246_s13, 3  ;;  %515 = vmatpush3.bf16.msra.mxu0 %v571_v3  ;;  %s242_s13 = sand.u32 1, %s631_s22  }
  0x18   : > { %s249_s19 = scalar_lea.vmem %s804_s0, %s499_s16  ;;  %s485_s14 = sshll.u32 %s242_s13, 3 }
  0x19   : > { %v572_v4 = vld [vmem:[%s249_s19] sm:$0xff]   ;;  %s244_s16 = scalar_lea.vmem [#allocation2], %s485_s14  ;;  %s409_s26 = scalar_lea.sflag [#allocation3], %s242_s13 }
  0x1a   : > { %517 = vmatmul.mubr.msk.bf16.vlgmr.msra.gmra.mrb[0].mxu0 %vm289_vm1, %v572_v4  ;;  %s422_s17 = sshll.u32 %s244_s16, 4  ;;  %s581_s29 = sshll.u32 %s644_s25, 4  ;;  %s763_s17 = int_to_ptr.vmem [resolvable:$true] %s422_s17  ;;  %s582_s29 = int_to_ptr.vmem [resolvable:$false] %s581_s29 }
  0x1b   : > { %s577_s28 = scalar_lea.vmem %s763_s17, 128  ;;  %s583_s9 = scalar_lea.vmem %s582_s29, 256 }
  0x1c   : > { %p578_p11 = scmp.ne.s32.totalorder %s763_s17, %s577_s28  ;;  %p584_p0 = scmp.lt.s32.totalorder %s763_s17, %s582_s29 }
  0x1d   : > { %p585_p1 = scmp.lt.s32.totalorder %s583_s9, %s577_s28 }
  0x1e   : > { %p579_p12 = pnand %p578_p11, %p718_p5 }
  0x1f   : > { %p586_p2 = por %p585_p1, %p584_p0 }
  0x20   : > { %p580_p13 = pneg %p579_p12 }
  0x22   : > { %p587_p3 = pnand %p586_p2, %p580_p13 }
  0x91   : > { %v346_v22 = vpop.permute.xlu0 %345 }
  0xed   : > { %v327_v9 = vpop.f32.mrb[0].mxu0 }
  0xee   : > { %v328_v10 = vadd.f32 %v488_v7, %v327_v9  ;;  %v518_v12 = vpop.f32.mrb[1].mxu0 }
  0xef   : > { %v330_v14 = vpop.f32.mrb[2].mxu0 }
  0xf0   : > { %v331_v15 = vadd.f32 %v488_v7, %v330_v14  ;;  %v519_v16 = vpop.f32.mrb[3].mxu0  ;;  %v338_v17 = vadd.f32 %v502_v11, %v328_v10 }
  0xf2   : > { %v339_v18 = vadd.f32 %v503_v13, %v331_v15 }
  0xf4   : > { %v341_v19 = vpack.c.bf16 %v339_v18, %v338_v17 }
  0xf6   : > { %v353_v20 = vsel %vm348_vm2, %v341_v19, 0 }
  0xf7   : > { %521 = vmatpush3.bf16.xpose.msra.mxu1 %v353_v20 }
  0xfe   : > { %523 = vmatmul.mubr.msk.bf16.vlgmr.msra.gmra.mrb[0].mxu1 %vm348_vm2, %v340_v21 }
 0x1d1   : > { %v389_v23 = vpop.f32.mrb[0].mxu1 }
 0x1d2   : > { %v390_v24 = vadd.f32 %v389_v23, %v346_v22  ;;  %v524_v25 = vpop.f32.mrb[1].mxu1 }
 0x1d3   : > { %v392_v26 = vpop.f32.mrb[2].mxu1 }
 0x1d4   : > { %v525_v27 = vpop.f32.mrb[3].mxu1  ;;  %v396_v28 = vsel %vm395_vm3, %v390_v24, -inf }
 0x1d5   : > { %397 = vmax.xlane.f32.xlu0 %v396_v28 }
 0x262   : > { %v398_v29 = vpop.xlane.xlu0 %397 }
 0x263   : > { %v399_v30 = vsub.f32 %v390_v24, %v398_v29 }
 0x265   : > { %v400_v31 = vmul.f32 1.442695, %v399_v30 }
 0x267   : > { %573 = vpow2.f32 %v400_v31 }
 0x271   : > { %v574_v32 = vpop.eup %573 }
 0x272   : > { %v402_v33 = vsel %vm395_vm3, %v574_v32, 0.0 }
 0x273   : > { %403 = vadd.xlane.f32.xlu1 %v402_v33 }
 0x300   : > { %v404_v34 = vpop.xlane.xlu1 %403 }
 0x301   : > { %575 = vrcp.f32 %v404_v34 }
 0x30b   : > { %v576_v35 = vpop.eup %575 }
 0x30c   : > { %v406_v36 = vmul.f32 %v576_v35, %v574_v32 }
 0x30e   : > { %407 = vst.msk [vmem:[%s244_s16] sm:$0xff] %vm395_vm3, %v406_v36 }
 0x30f   : > { %590 = shalt.err (!%p587_p3)
}
 0x310   : > { %s591_s10 = scalar_lea.hbm %s761_s20, 128  ;;  %s595_s13 = scalar_lea.hbm %s810_s6, 256 }
 0x311   : > { %p592_p4 = scmp.ne.s32.totalorder %s761_s20, %s591_s10  ;;  %p596_p9 = scmp.lt.u32.totalorder %s761_s20, %s810_s6 }
 0x312   : > { %p597_p10 = scmp.lt.u32.totalorder %s595_s13, %s591_s10  ;;  %p599_p12 = scmp.lt.u32.totalorder %s591_s10, %s761_s20 }
 0x313   : > { %p593_p7 = pnand %p592_p4, %p718_p5 }
 0x314   : > { %p598_p11 = por %p597_p10, %p596_p9 }
 0x315   : > { %p594_p8 = pneg %p593_p7 }
 0x316   : > { %p600_p13 = por %p599_p12, %p598_p11 }
 0x318   : > { %p601_p0 = pnand %p600_p13, %p594_p8 }
 0x31a   : > { %604 = shalt.err (!%p601_p0)
}
 0x31b   : > { %526 = dma.vmem_to_hbm [thread:$0]  (%p718_p5), %s763_s17, 128, %s761_s20, %s409_s26  }
 0x31c PF: > { %p532_p1 = scmp.ge.s32.totalorder %s639_s24, 2  ;;  %s434_s16 = sand.u32 1, %s627_s21  }
 0x31d   : > { %s435_s18 = scalar_lea.sflag [#allocation3], %s434_s16 }
 0x31e   : > { %p529_p2 = pnand %p532_p1, %p722_p6 }
 0x320   : > { %622 = dma.done.wait (!%p529_p2), %s435_s18, 128  }
 0x321   : > { %624 = vsyncadd (!%p529_p2), %s435_s18, 4294967168  ;;  %p16_p3 = scmp.ge.s32.totalorder %s705_s27, 4   ;;  %s813_s21 = smov %s631_s22 }
 0x322   : > { %s814_s22 = smov %s635_s23  ;;  %s815_s23 = smov %s716_s30 }
 0x323   : > { %s816_s24 = smov %s705_s27  ;;  %18 = sbr.rel (!%p16_p3) target bundleno = 3 (0x3), region = 79 }
 0x32a   :  { %440 = vsyncpa [#allocation3], 1 }
 0x32b   :  { %442 = vsyncpa [#allocation3 + $0x1], 1 }

</bundles_post_ra>
